<compile_context>
chip_gen: v5e
topology: v5e:2x2
jax: 0.10.0
libtpu: 0.0.40
codegen_flags: <defaults>
</compile_context>

<pallas_src>
import functools

import jax
import jax.numpy as jnp
from jax import lax
from jax.experimental import pallas as pl
from jax.experimental.pallas import tpu as pltpu


# ---------------------------------------------------------------------------
# Kernels
# ---------------------------------------------------------------------------
def rnn_layer_kernel(x_ref, w_ih_ref, w_hh_ref, b_ref, out_ref,
                     h_scratch, xp_scratch, *, unroll):
    """One intermediate nn.RNN (tanh) layer over one (seq_tile, B_tile) block.

    Grid = (batch_blocks, seq_blocks).  The sequence axis is serial
    ("arbitrary"); h_scratch carries the hidden state across sequence blocks
    and is reset at the first sequence block of every batch block.
    """
    t_blk = pl.program_id(1)

    @pl.when(t_blk == 0)
    def _():
        h_scratch[...] = jnp.zeros_like(h_scratch)      # h0 = zeros

    tt, bb, dd = x_ref.shape
    hh = w_hh_ref.shape[1]

    # Hoisted input projection: one big matmul for the whole tile (+ bias once).
    x_flat = x_ref[...].reshape(tt * bb, dd)
    xp = jnp.dot(x_flat, w_ih_ref[...], preferred_element_type=jnp.float32)
    xp_scratch[...] = (xp + b_ref[...]).reshape(tt, bb, hh)

    w_hh = w_hh_ref[...]                                # hoist weight load out of loop

    def step(t, h):
        h_new = jnp.tanh(
            xp_scratch[t]
            + jnp.dot(h, w_hh, preferred_element_type=jnp.float32))
        out_ref[t] = h_new.astype(out_ref.dtype)
        return h_new

    h_scratch[...] = lax.fori_loop(0, tt, step, h_scratch[...], unroll=unroll)


def rnn_last_layer_fc_kernel(x_ref, w_ih_ref, w_hh_ref, b_ref, w_fc_ref, b_fc_ref,
                             out_ref, h_scratch, xp_scratch, *, unroll):
    """Last RNN layer fused with the FC head.

    Only the (B, O) result is written (at the final sequence block); the last
    layer's (T, B, H) activations never touch HBM.
    """
    t_blk = pl.program_id(1)
    nt = pl.num_programs(1)

    @pl.when(t_blk == 0)
    def _():
        h_scratch[...] = jnp.zeros_like(h_scratch)

    tt, bb, dd = x_ref.shape
    hh = w_hh_ref.shape[1]

    x_flat = x_ref[...].reshape(tt * bb, dd)
    xp = jnp.dot(x_flat, w_ih_ref[...], preferred_element_type=jnp.float32)
    xp_scratch[...] = (xp + b_ref[...]).reshape(tt, bb, hh)

    w_hh = w_hh_ref[...]

    def step(t, h):
        return jnp.tanh(
            xp_scratch[t]
            + jnp.dot(h, w_hh, preferred_element_type=jnp.float32))

    h_final = lax.fori_loop(0, tt, step, h_scratch[...], unroll=unroll)
    h_scratch[...] = h_final

    @pl.when(t_blk == nt - 1)
    def _():
        out_ref[...] = (
            jnp.dot(h_final, w_fc_ref[...], preferred_element_type=jnp.float32)
            + b_fc_ref[...]
        ).astype(out_ref.dtype)


# ---------------------------------------------------------------------------
# Wrappers
# ---------------------------------------------------------------------------
def _round_up(x, m):
    return ((x + m - 1) // m) * m


def _pick_seq_tile(T, max_tile=128):
    best = 1
    for d in range(1, min(T, max_tile) + 1):
        if T % d == 0:
            best = d
    return best


def _pick_batch_tile(b_pad):
    # Give the "parallel" batch axis >= 2 blocks when the batch allows it
    # (v7x has 2 TensorCores; the time recurrence is serial, batch is not).
    if b_pad % 16 == 0:
        return b_pad // 2
    return b_pad


_COMPILER_PARAMS = pltpu.CompilerParams(
    dimension_semantics=("parallel", "arbitrary"),   # batch parallel, sequence serial
    vmem_limit_bytes=32 * 1024 * 1024,               # safe on v7x's 64 MiB VMEM too
)


def _rnn_layer(x_tbd, w_ih, w_hh, b_row, seq_tile):
    T, b_pad, d_pad = x_tbd.shape
    h_pad = w_hh.shape[1]
    b_tile = _pick_batch_tile(b_pad)
    nb, nt = b_pad // b_tile, T // seq_tile
    unroll = True if seq_tile <= 16 else 4

    kernel = functools.partial(rnn_layer_kernel, unroll=unroll)
    grid_spec = pltpu.PrefetchScalarGridSpec(
        num_scalar_prefetch=0,
        grid=(nb, nt),
        in_specs=[
            pl.BlockSpec((seq_tile, b_tile, d_pad), lambda b, t: (t, b, 0)),
            pl.BlockSpec((d_pad, h_pad), lambda b, t: (0, 0)),
            pl.BlockSpec((h_pad, h_pad), lambda b, t: (0, 0)),
            pl.BlockSpec((1, h_pad), lambda b, t: (0, 0)),
        ],
        out_specs=pl.BlockSpec((seq_tile, b_tile, h_pad), lambda b, t: (t, b, 0)),
        scratch_shapes=[
            pltpu.VMEM((b_tile, h_pad), jnp.float32),             # running hidden state
            pltpu.VMEM((seq_tile, b_tile, h_pad), jnp.float32),   # hoisted X@W_ih + b
        ],
    )
    return pl.pallas_call(
        kernel,
        out_shape=jax.ShapeDtypeStruct((T, b_pad, h_pad), jnp.float32),
        grid_spec=grid_spec,
        compiler_params=_COMPILER_PARAMS,
    )(x_tbd, w_ih, w_hh, b_row)


def _rnn_last_layer_fc(x_tbd, w_ih, w_hh, b_row, w_fc, b_fc, seq_tile):
    T, b_pad, d_pad = x_tbd.shape
    h_pad = w_hh.shape[1]
    o_pad = w_fc.shape[1]
    b_tile = _pick_batch_tile(b_pad)
    nb, nt = b_pad // b_tile, T // seq_tile
    unroll = True if seq_tile <= 16 else 4

    kernel = functools.partial(rnn_last_layer_fc_kernel, unroll=unroll)
    grid_spec = pltpu.PrefetchScalarGridSpec(
        num_scalar_prefetch=0,
        grid=(nb, nt),
        in_specs=[
            pl.BlockSpec((seq_tile, b_tile, d_pad), lambda b, t: (t, b, 0)),
            pl.BlockSpec((d_pad, h_pad), lambda b, t: (0, 0)),
            pl.BlockSpec((h_pad, h_pad), lambda b, t: (0, 0)),
            pl.BlockSpec((1, h_pad), lambda b, t: (0, 0)),
            pl.BlockSpec((h_pad, o_pad), lambda b, t: (0, 0)),
            pl.BlockSpec((1, o_pad), lambda b, t: (0, 0)),
        ],
        out_specs=pl.BlockSpec((b_tile, o_pad), lambda b, t: (b, 0)),
        scratch_shapes=[
            pltpu.VMEM((b_tile, h_pad), jnp.float32),
            pltpu.VMEM((seq_tile, b_tile, h_pad), jnp.float32),
        ],
    )
    return pl.pallas_call(
        kernel,
        out_shape=jax.ShapeDtypeStruct((b_pad, o_pad), jnp.float32),
        grid_spec=grid_spec,
        compiler_params=_COMPILER_PARAMS,
    )(x_tbd, w_ih, w_hh, b_row, w_fc, b_fc)


def rnn_model_forward(x_btd, params, *, seq_tile=None):
    """Equivalent of RNNModel.forward (eval / dropout_prob=0).  x_btd: (B, T, D)."""
    B, T, D = x_btd.shape
    H = params["rnn_layers"][0][1].shape[0]
    O = params["fc_w_t"].shape[1]

    b_pad = _round_up(B, 8)
    d_pad = _round_up(D, 8)
    h_pad = _round_up(H, 128)
    o_pad = _round_up(O, 128)
    seq_tile = seq_tile if seq_tile is not None else _pick_seq_tile(T)

    f32 = jnp.float32
    # Seq-major, f32, zero-padded batch / feature dims.
    x = jnp.transpose(x_btd.astype(f32), (1, 0, 2))
    x = jnp.pad(x, ((0, 0), (0, b_pad - B), (0, d_pad - D)))

    n_layers = len(params["rnn_layers"])
    h_seq = x
    out_pad = None
    for l, (w_ih_t, w_hh_t, b_row) in enumerate(params["rnn_layers"]):
        d_in = w_ih_t.shape[0]
        d_in_pad = d_pad if l == 0 else h_pad
        # Zero padding: padded hidden lanes stay exactly 0 through the recurrence.
        w_ih_p = jnp.pad(w_ih_t.astype(f32), ((0, d_in_pad - d_in), (0, h_pad - H)))
        w_hh_p = jnp.pad(w_hh_t.astype(f32), ((0, h_pad - H), (0, h_pad - H)))
        b_p = jnp.pad(b_row.astype(f32), ((0, 0), (0, h_pad - H)))
        if l < n_layers - 1:
            h_seq = _rnn_layer(h_seq, w_ih_p, w_hh_p, b_p, seq_tile)
            # TODO(synk): inter-layer dropout (train-mode nn.RNN) omitted; this
            # matches eval / dropout_prob=0.0 semantics.
        else:
            w_fc_p = jnp.pad(params["fc_w_t"].astype(f32),
                             ((0, h_pad - H), (0, o_pad - O)))
            b_fc_p = jnp.pad(params["fc_b_row"].astype(f32), ((0, 0), (0, o_pad - O)))
            out_pad = _rnn_last_layer_fc(h_seq, w_ih_p, w_hh_p, b_p,
                                         w_fc_p, b_fc_p, seq_tile)
    return out_pad[:B, :O]


# ---------------------------------------------------------------------------
# Deterministic parameter init (PyTorch-style uniform(-1/sqrt(H), 1/sqrt(H)))
# ---------------------------------------------------------------------------
def init_params(key, input_dim, hidden_dim, layer_dim, output_dim):
    k_rnn = 1.0 / jnp.sqrt(hidden_dim)
    layers = []
    for l in range(layer_dim):
        d_in = input_dim if l == 0 else hidden_dim
        key, k1, k2, k3, k4 = jax.random.split(key, 5)
        w_ih = jax.random.uniform(k1, (hidden_dim, d_in), jnp.float32, -k_rnn, k_rnn)
        w_hh = jax.random.uniform(k2, (hidden_dim, hidden_dim), jnp.float32, -k_rnn, k_rnn)
        b_ih = jax.random.uniform(k3, (hidden_dim,), jnp.float32, -k_rnn, k_rnn)
        b_hh = jax.random.uniform(k4, (hidden_dim,), jnp.float32, -k_rnn, k_rnn)
        layers.append((w_ih.T, w_hh.T, (b_ih + b_hh)[None, :]))
    k_fc = 1.0 / jnp.sqrt(hidden_dim)
    key, k1, k2 = jax.random.split(key, 3)
    fc_w = jax.random.uniform(k1, (output_dim, hidden_dim), jnp.float32, -k_fc, k_fc)
    fc_b = jax.random.uniform(k2, (output_dim,), jnp.float32, -k_fc, k_fc)
    return {"rnn_layers": layers, "fc_w_t": fc_w.T, "fc_b_row": fc_b[None, :]}


# ---------------------------------------------------------------------------
# Pure-JAX reference (same math) for a sanity check
# ---------------------------------------------------------------------------
def reference_forward(x_btd, params):
    h_seq = jnp.transpose(x_btd.astype(jnp.float32), (1, 0, 2))
    for (w_ih_t, w_hh_t, b_row) in params["rnn_layers"]:
        T, B, _ = h_seq.shape
        H = w_hh_t.shape[0]
        h = jnp.zeros((B, H), jnp.float32)
        outs = []
        for t in range(T):
            h = jnp.tanh(h_seq[t] @ w_ih_t + h @ w_hh_t + b_row)
            outs.append(h)
        h_seq = jnp.stack(outs, axis=0)
    return h_seq[-1] @ params["fc_w_t"] + params["fc_b_row"]


if __name__ == "__main__":
    # Small shapes consistent with the module's forward.
    batch, seq_len = 2, 8
    input_dim, hidden_dim, layer_dim, output_dim = 8, 32, 2, 4
    dropout_prob = 0.0

    key = jax.random.PRNGKey(0)
    key, kx = jax.random.split(key)
    x = jax.random.normal(kx, (batch, seq_len, input_dim), jnp.float32)
    params = init_params(key, input_dim, hidden_dim, layer_dim, output_dim)

    ref = reference_forward(x, params)

    # Default tiling (single sequence block).
    out = jax.block_until_ready(rnn_model_forward(x, params))
    assert out.shape == (batch, output_dim)
    assert jnp.allclose(out, ref, atol=1e-4, rtol=1e-4), "default tiling mismatch"

    # Explicit sequence tiling (2 grid steps) — exercises the h_scratch
    # accumulator persisting correctly across pipelined grid iterations.
    out_tiled = jax.block_until_ready(rnn_model_forward(x, params, seq_tile=4))
    assert jnp.allclose(out_tiled, ref, atol=1e-4, rtol=1e-4), "seq-tiled mismatch"

    print("KERNEL_OK")
</pallas_src>

<mosaic_0001>
module attributes {stable_mosaic.version = 11 : i64} {
  func.func @rnn_layer_kernel(%arg0: i32, %arg1: i32, %arg2: memref<8x8x8xf32, #tpu.memory_space<vmem>>, %arg3: memref<8x128xf32, #tpu.memory_space<vmem>>, %arg4: memref<128x128xf32, #tpu.memory_space<vmem>>, %arg5: memref<1x128xf32, #tpu.memory_space<vmem>>, %arg6: memref<8x8x128xf32, #tpu.memory_space<vmem>>, %arg7: memref<8x128xf32, #tpu.memory_space<vmem>>, %arg8: memref<8x8x128xf32, #tpu.memory_space<vmem>>) attributes {dimension_semantics = [#tpu.dimension_semantics<parallel>, #tpu.dimension_semantics<arbitrary>], iteration_bounds = array<i64: 1, 1>, scalar_prefetch = 0 : i64, scratch_operands = 2 : i64, tpu.core_type = #tpu.core_type<tc>, window_params = [{transform_indices = @transform_0, window_bounds = array<i64: 8, 8, 8>}, {pipeline_mode = #tpu.pipeline_mode<synchronous>, transform_indices = @transform_1, window_bounds = array<i64: 8, 128>}, {pipeline_mode = #tpu.pipeline_mode<synchronous>, transform_indices = @transform_2, window_bounds = array<i64: 128, 128>}, {pipeline_mode = #tpu.pipeline_mode<synchronous>, transform_indices = @transform_3, window_bounds = array<i64: 1, 128>}, {transform_indices = @transform_4, window_bounds = array<i64: 8, 8, 128>}]} {
    %c0_i32 = arith.constant 0 : i32
    %0 = arith.cmpi eq, %arg1, %c0_i32 : i32
    %1 = arith.extui %0 : i1 to i32
    %c0_i32_0 = arith.constant 0 : i32
    %2 = arith.cmpi ne, %1, %c0_i32_0 : i32
    scf.if %2 {
      %cst_57 = arith.constant 0.000000e+00 : f32
      %95 = vector.broadcast %cst_57 : f32 to vector<8x128xf32>
      %c0_58 = arith.constant 0 : index
      %c0_59 = arith.constant 0 : index
      %96 = vector.load %arg7[%c0_58, %c0_59] : memref<8x128xf32, #tpu.memory_space<vmem>>, vector<8x128xf32>
      tpu.vector_store %arg7[%c0_58, %c0_59], %95 {strides = array<i32>} : memref<8x128xf32, #tpu.memory_space<vmem>>, vector<8x128xf32>,
    } else {
    }
    %c0 = arith.constant 0 : index
    %c0_1 = arith.constant 0 : index
    %c0_2 = arith.constant 0 : index
    %3 = vector.load %arg2[%c0, %c0_1, %c0_2] : memref<8x8x8xf32, #tpu.memory_space<vmem>>, vector<8x8x8xf32>
    %4 = vector.shape_cast %3 : vector<8x8x8xf32> to vector<64x8xf32>
    %c0_3 = arith.constant 0 : index
    %c0_4 = arith.constant 0 : index
    %5 = vector.load %arg3[%c0_3, %c0_4] : memref<8x128xf32, #tpu.memory_space<vmem>>, vector<8x128xf32>
    %cst = arith.constant dense<0.000000e+00> : vector<64x128xf32>
    %6 = tpu.matmul %4, %5, %cst {dimension_numbers = #tpu.dot_dimension_numbers<[1], [0], [0], [1], [0, 0, 1, 1], [], []>} : vector<64x8xf32>, vector<8x128xf32>, vector<64x128xf32> -> vector<64x128xf32>
    %c0_5 = arith.constant 0 : index
    %c0_6 = arith.constant 0 : index
    %7 = vector.load %arg5[%c0_5, %c0_6] : memref<1x128xf32, #tpu.memory_space<vmem>>, vector<1x128xf32>
    %8 = vector.broadcast %7 : vector<1x128xf32> to vector<64x128xf32>
    %9 = arith.addf %6, %8 : vector<64x128xf32>
    %10 = vector.shape_cast %9 : vector<64x128xf32> to vector<8x8x128xf32>
    %c0_7 = arith.constant 0 : index
    %c0_8 = arith.constant 0 : index
    %c0_9 = arith.constant 0 : index
    %11 = vector.load %arg8[%c0_7, %c0_8, %c0_9] : memref<8x8x128xf32, #tpu.memory_space<vmem>>, vector<8x8x128xf32>
    tpu.vector_store %arg8[%c0_7, %c0_8, %c0_9], %10 {strides = array<i32>} : memref<8x8x128xf32, #tpu.memory_space<vmem>>, vector<8x8x128xf32>,
    %c0_10 = arith.constant 0 : index
    %c0_11 = arith.constant 0 : index
    %12 = vector.load %arg4[%c0_10, %c0_11] : memref<128x128xf32, #tpu.memory_space<vmem>>, vector<128x128xf32>
    %c0_12 = arith.constant 0 : index
    %c0_13 = arith.constant 0 : index
    %13 = vector.load %arg7[%c0_12, %c0_13] : memref<8x128xf32, #tpu.memory_space<vmem>>, vector<8x128xf32>
    %c0_i32_14 = arith.constant 0 : i32
    %14 = arith.index_cast %c0_i32_14 : i32 to index
    %c0_15 = arith.constant 0 : index
    %c0_16 = arith.constant 0 : index
    %15 = vector.load %arg8[%14, %c0_15, %c0_16] : memref<8x8x128xf32, #tpu.memory_space<vmem>>, vector<1x8x128xf32>
    %16 = vector.shape_cast %15 : vector<1x8x128xf32> to vector<8x128xf32>
    %cst_17 = arith.constant dense<0.000000e+00> : vector<8x128xf32>
    %17 = tpu.matmul %13, %12, %cst_17 {dimension_numbers = #tpu.dot_dimension_numbers<[1], [0], [0], [1], [0, 0, 1, 1], [], []>} : vector<8x128xf32>, vector<128x128xf32>, vector<8x128xf32> -> vector<8x128xf32>
    %18 = arith.addf %16, %17 : vector<8x128xf32>
    %19 = math.tanh %18 : vector<8x128xf32>
    %20 = arith.index_cast %c0_i32_14 : i32 to index
    %c0_18 = arith.constant 0 : index
    %c0_19 = arith.constant 0 : index
    %21 = vector.load %arg6[%20, %c0_18, %c0_19] : memref<8x8x128xf32, #tpu.memory_space<vmem>>, vector<1x8x128xf32>
    %22 = vector.shape_cast %21 : vector<1x8x128xf32> to vector<8x128xf32>
    %23 = vector.shape_cast %19 : vector<8x128xf32> to vector<1x8x128xf32>
    tpu.vector_store %arg6[%20, %c0_18, %c0_19], %23 {strides = array<i32>} : memref<8x8x128xf32, #tpu.memory_space<vmem>>, vector<1x8x128xf32>,
    %c1_i32 = arith.constant 1 : i32
    %24 = arith.index_cast %c1_i32 : i32 to index
    %c0_20 = arith.constant 0 : index
    %c0_21 = arith.constant 0 : index
    %25 = vector.load %arg8[%24, %c0_20, %c0_21] : memref<8x8x128xf32, #tpu.memory_space<vmem>>, vector<1x8x128xf32>
    %26 = vector.shape_cast %25 : vector<1x8x128xf32> to vector<8x128xf32>
    %cst_22 = arith.constant dense<0.000000e+00> : vector<8x128xf32>
    %27 = tpu.matmul %19, %12, %cst_22 {dimension_numbers = #tpu.dot_dimension_numbers<[1], [0], [0], [1], [0, 0, 1, 1], [], []>} : vector<8x128xf32>, vector<128x128xf32>, vector<8x128xf32> -> vector<8x128xf32>
    %28 = arith.addf %26, %27 : vector<8x128xf32>
    %29 = math.tanh %28 : vector<8x128xf32>
    %30 = arith.index_cast %c1_i32 : i32 to index
    %c0_23 = arith.constant 0 : index
    %c0_24 = arith.constant 0 : index
    %31 = vector.load %arg6[%30, %c0_23, %c0_24] : memref<8x8x128xf32, #tpu.memory_space<vmem>>, vector<1x8x128xf32>
    %32 = vector.shape_cast %31 : vector<1x8x128xf32> to vector<8x128xf32>
    %33 = vector.shape_cast %29 : vector<8x128xf32> to vector<1x8x128xf32>
    tpu.vector_store %arg6[%30, %c0_23, %c0_24], %33 {strides = array<i32>} : memref<8x8x128xf32, #tpu.memory_space<vmem>>, vector<1x8x128xf32>,
    %c2_i32 = arith.constant 2 : i32
    %34 = arith.index_cast %c2_i32 : i32 to index
    %c0_25 = arith.constant 0 : index
    %c0_26 = arith.constant 0 : index
    %35 = vector.load %arg8[%34, %c0_25, %c0_26] : memref<8x8x128xf32, #tpu.memory_space<vmem>>, vector<1x8x128xf32>
    %36 = vector.shape_cast %35 : vector<1x8x128xf32> to vector<8x128xf32>
    %cst_27 = arith.constant dense<0.000000e+00> : vector<8x128xf32>
    %37 = tpu.matmul %29, %12, %cst_27 {dimension_numbers = #tpu.dot_dimension_numbers<[1], [0], [0], [1], [0, 0, 1, 1], [], []>} : vector<8x128xf32>, vector<128x128xf32>, vector<8x128xf32> -> vector<8x128xf32>
    %38 = arith.addf %36, %37 : vector<8x128xf32>
    %39 = math.tanh %38 : vector<8x128xf32>
    %40 = arith.index_cast %c2_i32 : i32 to index
    %c0_28 = arith.constant 0 : index
    %c0_29 = arith.constant 0 : index
    %41 = vector.load %arg6[%40, %c0_28, %c0_29] : memref<8x8x128xf32, #tpu.memory_space<vmem>>, vector<1x8x128xf32>
    %42 = vector.shape_cast %41 : vector<1x8x128xf32> to vector<8x128xf32>
    %43 = vector.shape_cast %39 : vector<8x128xf32> to vector<1x8x128xf32>
    tpu.vector_store %arg6[%40, %c0_28, %c0_29], %43 {strides = array<i32>} : memref<8x8x128xf32, #tpu.memory_space<vmem>>, vector<1x8x128xf32>,
    %c3_i32 = arith.constant 3 : i32
    %44 = arith.index_cast %c3_i32 : i32 to index
    %c0_30 = arith.constant 0 : index
    %c0_31 = arith.constant 0 : index
    %45 = vector.load %arg8[%44, %c0_30, %c0_31] : memref<8x8x128xf32, #tpu.memory_space<vmem>>, vector<1x8x128xf32>
    %46 = vector.shape_cast %45 : vector<1x8x128xf32> to vector<8x128xf32>
    %cst_32 = arith.constant dense<0.000000e+00> : vector<8x128xf32>
    %47 = tpu.matmul %39, %12, %cst_32 {dimension_numbers = #tpu.dot_dimension_numbers<[1], [0], [0], [1], [0, 0, 1, 1], [], []>} : vector<8x128xf32>, vector<128x128xf32>, vector<8x128xf32> -> vector<8x128xf32>
    %48 = arith.addf %46, %47 : vector<8x128xf32>
    %49 = math.tanh %48 : vector<8x128xf32>
    %50 = arith.index_cast %c3_i32 : i32 to index
    %c0_33 = arith.constant 0 : index
    %c0_34 = arith.constant 0 : index
    %51 = vector.load %arg6[%50, %c0_33, %c0_34] : memref<8x8x128xf32, #tpu.memory_space<vmem>>, vector<1x8x128xf32>
    %52 = vector.shape_cast %51 : vector<1x8x128xf32> to vector<8x128xf32>
    %53 = vector.shape_cast %49 : vector<8x128xf32> to vector<1x8x128xf32>
    tpu.vector_store %arg6[%50, %c0_33, %c0_34], %53 {strides = array<i32>} : memref<8x8x128xf32, #tpu.memory_space<vmem>>, vector<1x8x128xf32>,
    %c4_i32 = arith.constant 4 : i32
    %54 = arith.index_cast %c4_i32 : i32 to index
    %c0_35 = arith.constant 0 : index
    %c0_36 = arith.constant 0 : index
    %55 = vector.load %arg8[%54, %c0_35, %c0_36] : memref<8x8x128xf32, #tpu.memory_space<vmem>>, vector<1x8x128xf32>
    %56 = vector.shape_cast %55 : vector<1x8x128xf32> to vector<8x128xf32>
    %cst_37 = arith.constant dense<0.000000e+00> : vector<8x128xf32>
    %57 = tpu.matmul %49, %12, %cst_37 {dimension_numbers = #tpu.dot_dimension_numbers<[1], [0], [0], [1], [0, 0, 1, 1], [], []>} : vector<8x128xf32>, vector<128x128xf32>, vector<8x128xf32> -> vector<8x128xf32>
    %58 = arith.addf %56, %57 : vector<8x128xf32>
    %59 = math.tanh %58 : vector<8x128xf32>
    %60 = arith.index_cast %c4_i32 : i32 to index
    %c0_38 = arith.constant 0 : index
    %c0_39 = arith.constant 0 : index
    %61 = vector.load %arg6[%60, %c0_38, %c0_39] : memref<8x8x128xf32, #tpu.memory_space<vmem>>, vector<1x8x128xf32>
    %62 = vector.shape_cast %61 : vector<1x8x128xf32> to vector<8x128xf32>
    %63 = vector.shape_cast %59 : vector<8x128xf32> to vector<1x8x128xf32>
    tpu.vector_store %arg6[%60, %c0_38, %c0_39], %63 {strides = array<i32>} : memref<8x8x128xf32, #tpu.memory_space<vmem>>, vector<1x8x128xf32>,
    %c5_i32 = arith.constant 5 : i32
    %64 = arith.index_cast %c5_i32 : i32 to index
    %c0_40 = arith.constant 0 : index
    %c0_41 = arith.constant 0 : index
    %65 = vector.load %arg8[%64, %c0_40, %c0_41] : memref<8x8x128xf32, #tpu.memory_space<vmem>>, vector<1x8x128xf32>
    %66 = vector.shape_cast %65 : vector<1x8x128xf32> to vector<8x128xf32>
    %cst_42 = arith.constant dense<0.000000e+00> : vector<8x128xf32>
    %67 = tpu.matmul %59, %12, %cst_42 {dimension_numbers = #tpu.dot_dimension_numbers<[1], [0], [0], [1], [0, 0, 1, 1], [], []>} : vector<8x128xf32>, vector<128x128xf32>, vector<8x128xf32> -> vector<8x128xf32>
    %68 = arith.addf %66, %67 : vector<8x128xf32>
    %69 = math.tanh %68 : vector<8x128xf32>
    %70 = arith.index_cast %c5_i32 : i32 to index
    %c0_43 = arith.constant 0 : index
    %c0_44 = arith.constant 0 : index
    %71 = vector.load %arg6[%70, %c0_43, %c0_44] : memref<8x8x128xf32, #tpu.memory_space<vmem>>, vector<1x8x128xf32>
    %72 = vector.shape_cast %71 : vector<1x8x128xf32> to vector<8x128xf32>
    %73 = vector.shape_cast %69 : vector<8x128xf32> to vector<1x8x128xf32>
    tpu.vector_store %arg6[%70, %c0_43, %c0_44], %73 {strides = array<i32>} : memref<8x8x128xf32, #tpu.memory_space<vmem>>, vector<1x8x128xf32>,
    %c6_i32 = arith.constant 6 : i32
    %74 = arith.index_cast %c6_i32 : i32 to index
    %c0_45 = arith.constant 0 : index
    %c0_46 = arith.constant 0 : index
    %75 = vector.load %arg8[%74, %c0_45, %c0_46] : memref<8x8x128xf32, #tpu.memory_space<vmem>>, vector<1x8x128xf32>
    %76 = vector.shape_cast %75 : vector<1x8x128xf32> to vector<8x128xf32>
    %cst_47 = arith.constant dense<0.000000e+00> : vector<8x128xf32>
    %77 = tpu.matmul %69, %12, %cst_47 {dimension_numbers = #tpu.dot_dimension_numbers<[1], [0], [0], [1], [0, 0, 1, 1], [], []>} : vector<8x128xf32>, vector<128x128xf32>, vector<8x128xf32> -> vector<8x128xf32>
    %78 = arith.addf %76, %77 : vector<8x128xf32>
    %79 = math.tanh %78 : vector<8x128xf32>
    %80 = arith.index_cast %c6_i32 : i32 to index
    %c0_48 = arith.constant 0 : index
    %c0_49 = arith.constant 0 : index
    %81 = vector.load %arg6[%80, %c0_48, %c0_49] : memref<8x8x128xf32, #tpu.memory_space<vmem>>, vector<1x8x128xf32>
    %82 = vector.shape_cast %81 : vector<1x8x128xf32> to vector<8x128xf32>
    %83 = vector.shape_cast %79 : vector<8x128xf32> to vector<1x8x128xf32>
    tpu.vector_store %arg6[%80, %c0_48, %c0_49], %83 {strides = array<i32>} : memref<8x8x128xf32, #tpu.memory_space<vmem>>, vector<1x8x128xf32>,
    %c7_i32 = arith.constant 7 : i32
    %84 = arith.index_cast %c7_i32 : i32 to index
    %c0_50 = arith.constant 0 : index
    %c0_51 = arith.constant 0 : index
    %85 = vector.load %arg8[%84, %c0_50, %c0_51] : memref<8x8x128xf32, #tpu.memory_space<vmem>>, vector<1x8x128xf32>
    %86 = vector.shape_cast %85 : vector<1x8x128xf32> to vector<8x128xf32>
    %cst_52 = arith.constant dense<0.000000e+00> : vector<8x128xf32>
    %87 = tpu.matmul %79, %12, %cst_52 {dimension_numbers = #tpu.dot_dimension_numbers<[1], [0], [0], [1], [0, 0, 1, 1], [], []>} : vector<8x128xf32>, vector<128x128xf32>, vector<8x128xf32> -> vector<8x128xf32>
    %88 = arith.addf %86, %87 : vector<8x128xf32>
    %89 = math.tanh %88 : vector<8x128xf32>
    %90 = arith.index_cast %c7_i32 : i32 to index
    %c0_53 = arith.constant 0 : index
    %c0_54 = arith.constant 0 : index
    %91 = vector.load %arg6[%90, %c0_53, %c0_54] : memref<8x8x128xf32, #tpu.memory_space<vmem>>, vector<1x8x128xf32>
    %92 = vector.shape_cast %91 : vector<1x8x128xf32> to vector<8x128xf32>
    %93 = vector.shape_cast %89 : vector<8x128xf32> to vector<1x8x128xf32>
    tpu.vector_store %arg6[%90, %c0_53, %c0_54], %93 {strides = array<i32>} : memref<8x8x128xf32, #tpu.memory_space<vmem>>, vector<1x8x128xf32>,
    %c8_i32 = arith.constant 8 : i32
    %c0_55 = arith.constant 0 : index
    %c0_56 = arith.constant 0 : index
    %94 = vector.load %arg7[%c0_55, %c0_56] : memref<8x128xf32, #tpu.memory_space<vmem>>, vector<8x128xf32>
    tpu.vector_store %arg7[%c0_55, %c0_56], %89 {strides = array<i32>} : memref<8x128xf32, #tpu.memory_space<vmem>>, vector<8x128xf32>,
    return
  }
  func.func @transform_0(%arg0: i32, %arg1: i32) -> (i32, i32, i32) {
    %c0_i32 = arith.constant 0 : i32
    %c0_i32_0 = arith.constant 0 : i32
    return %arg1, %arg0, %c0_i32 : i32, i32, i32
  }
  func.func @transform_1(%arg0: i32, %arg1: i32) -> (i32, i32) {
    %c0_i32 = arith.constant 0 : i32
    %c0_i32_0 = arith.constant 0 : i32
    %c0_i32_1 = arith.constant 0 : i32
    return %c0_i32, %c0_i32_0 : i32, i32
  }
  func.func @transform_2(%arg0: i32, %arg1: i32) -> (i32, i32) {
    %c0_i32 = arith.constant 0 : i32
    %c0_i32_0 = arith.constant 0 : i32
    %c0_i32_1 = arith.constant 0 : i32
    return %c0_i32, %c0_i32_0 : i32, i32
  }
  func.func @transform_3(%arg0: i32, %arg1: i32) -> (i32, i32) {
    %c0_i32 = arith.constant 0 : i32
    %c0_i32_0 = arith.constant 0 : i32
    %c0_i32_1 = arith.constant 0 : i32
    return %c0_i32, %c0_i32_0 : i32, i32
  }
  func.func @transform_4(%arg0: i32, %arg1: i32) -> (i32, i32, i32) {
    %c0_i32 = arith.constant 0 : i32
    %c0_i32_0 = arith.constant 0 : i32
    return %arg1, %arg0, %c0_i32 : i32, i32, i32
  }
}

</mosaic_0001>

<bundles_post_ra>
// kernel: tpu_custom_call.1
= control target key start
LH: loop header
LB: loop body
LE: loop exit
PB: predicated region body
PF: predicated region fallthrough
CT: control target
= control target key end

     0   :  { %9 = vsyncpa [#allocation5], 0  ;;  %s767_s0 = inlined_call_operand.hbm [shape: f32[8,8,8], index: 0, kind: input, shape index: {}]   ;;  %s768_s1 = inlined_call_operand.hbm [shape: f32[8,128], index: 1, kind: input, shape index: {}]   ;;  %s769_s2 = inlined_call_operand.hbm [shape: f32[128,128], index: 2, kind: input, shape index: {}]   ;;  %s770_s3 = inlined_call_operand.vmem [shape: f32[1,128], index: 3, kind: input, shape index: {}]   ;;  %s771_s4 = inlined_call_operand.hbm [shape: f32[8,8,128], index: 4, kind: output, shape index: {}]  }
   0x1   :  { %10 = vsyncpa [#allocation8], 0  ;;  %s30_s17 = sshll.u32 %s768_s1, 4  ;;  %s31_s17 = int_to_ptr.hbm [resolvable:$true] %s30_s17 }
   0x2   :  { %11 = vsyncpa [#allocation6], 0  ;;  %s533_s18 = smov [#allocation7]   ;;  %s16_s22 = sshll.u32 %s767_s0, 4  ;;  %s17_s22 = int_to_ptr.hbm [resolvable:$true] %s16_s22 }
   0x3   :  { %s32_s19 = sshll.u32 %s533_s18, 4  ;;  %s534_s23 = smov [#allocation4]   ;;  %s33_s19 = int_to_ptr.vmem [resolvable:$true] %s32_s19 }
   0x4   :  { %35 = dma.hbm_to_vmem [thread:$0]  %s31_s17, 128, %s33_s19, [#allocation8]  }
   0x5   :  { %s18_s24 = sshll.u32 %s534_s23, 4  ;;  %s535_s25 = smov 128   ;;  %s19_s24 = int_to_ptr.vmem [resolvable:$true] %s18_s24 }
   0x6   :  { %s536_s26 = smov 8   ;;  %s40_s28 = sshll.u32 %s769_s2, 4  ;;  %s41_s28 = int_to_ptr.hbm [resolvable:$true] %s40_s28 }
   0x7   :  { %24 = dma.hbm_to_vmem [thread:$0]  %s17_s22, 1024, %s19_s24, [#allocation5], %s535_s25, %s535_s25, %s536_s26  }
   0x8   :  { %s537_s29 = smov [#allocation9]  }
   0x9   :  { %s42_s30 = sshll.u32 %s537_s29, 4  ;;  %s43_s30 = int_to_ptr.vmem [resolvable:$true] %s42_s30 }
   0xa   :  { %48 = dma.hbm_to_vmem [thread:$0]  %s41_s28, 2048, %s43_s30, [#allocation8], %s535_s25, %s535_s25, %s536_s26  }
   0xb   :  { %527 = dma.done.wait [#allocation5], 1024  }
   0xc   :  { %528 = vsyncadd [#allocation5], 4294966272 }
   0xd   :  { %529 = dma.done.wait [#allocation8], 2176  }
   0xe   :  { %530 = vsyncadd [#allocation8], 4294965120  ;;  %v580_v0 = vld [vmem:[#allocation9 + $0x78] sm:$0xff]  ;;  %v582_v1 = vld [vmem:[#allocation9 + $0x70] sm:$0xff]  ;;  %vm81_vm0 = vcmask 64512   ;;  %v538_v18 = vmov 0.0  }
   0xf   :  { %173 = vmatpush.msra.mxu1 %v580_v0  ;;  %198 = vmatpush.msra.mxu2 %v580_v0  ;;  %v586_v2 = vld [vmem:[#allocation9 + $0x68] sm:$0xff]  ;;  %v591_v3 = vld [vmem:[#allocation9 + $0x60] sm:$0xff]  ;;  %v76_v4 = vld [vmem:[#allocation7] sm:$0xff]  ;;  %s385_s8 = sshll.u32 %s771_s4, 4  ;;  %s386_s8 = int_to_ptr.hbm [resolvable:$true] %s385_s8 }
  0x10   :  { %224 = vmatpush.msra.mxu3 %v580_v0  ;;  %121 = vmatpush.msra.mxu0 %v76_v4  ;;  %v68_v5 = vld [vmem:[#allocation4] sm:$0xff]  ;;  %v601_v7 = vld [vmem:[#allocation9 + $0x50] sm:$0xff]  ;;  %v607_v8 = vld [vmem:[#allocation9 + $0x48] sm:$0xff] }
  0x11   :  { %174 = vmatpush.msra.mxu1 %v582_v1  ;;  %199 = vmatpush.msra.mxu2 %v582_v1  ;;  %v595_v6 = vld [vmem:[#allocation9 + $0x58] sm:$0xff]  ;;  %v613_v9 = vld [vmem:[#allocation9 + $0x40] sm:$0xff]  ;;  %v625_v11 = vld [vmem:[#allocation9 + $0x30] sm:$0xff] }
  0x12   :  { %225 = vmatpush.msra.mxu3 %v582_v1  ;;  %399 = vmatmul.msk.f32.vlgmr.msra.gmra.mxu0 %vm81_vm0, %v68_v5  ;;  %v619_v10 = vld [vmem:[#allocation9 + $0x38] sm:$0xff]  ;;  %v631_v12 = vld [vmem:[#allocation9 + $0x28] sm:$0xff]  ;;  %v637_v13 = vld [vmem:[#allocation9 + $0x20] sm:$0xff] }
  0x13   :  { %175 = vmatpush.msra.mxu1 %v586_v2  ;;  %200 = vmatpush.msra.mxu2 %v586_v2  ;;  %v643_v14 = vld [vmem:[#allocation9 + $0x18] sm:$0xff]  ;;  %v649_v15 = vld [vmem:[#allocation9 + $0x10] sm:$0xff]  ;;  %v655_v16 = vld [vmem:[#allocation9 + $0x8] sm:$0xff] }
  0x14   :  { %226 = vmatpush.msra.mxu3 %v586_v2  ;;  %328 = vmatpush.msrb.mxu0 %v580_v0  ;;  %v661_v17 = vld [vmem:[#allocation9] sm:$0xff]  ;;  %v745_v20 = vld [vmem:[%s770_s3] ss:$0 sm:$0xff]  ;;  %v70_v26 = vld [vmem:[#allocation4 + $0x10] sm:$0xff]  ;;  %s539_s3 = smov [#allocation10]  }
  0x15   :  { %176 = vmatpush.msra.mxu1 %v591_v3  ;;  %201 = vmatpush.msra.mxu2 %v591_v3  ;;  %v69_v19 = vld [vmem:[#allocation4 + $0x8] sm:$0xff]  ;;  %v71_v32 = vld [vmem:[#allocation4 + $0x18] sm:$0xff]  ;;  %v72_v38 = vld [vmem:[#allocation4 + $0x20] sm:$0xff]  ;;  %s383_s5 = sshll.u32 %s539_s3, 4  ;;  %s384_s5 = int_to_ptr.vmem [resolvable:$true] %s383_s5 }
  0x16   :  { %227 = vmatpush.msra.mxu3 %v591_v3  ;;  %329 = vmatpush.msrb.mxu0 %v582_v1  ;;  %v73_v44 = vld [vmem:[#allocation4 + $0x28] sm:$0xff]  ;;  %v74_v45 = vld [vmem:[#allocation4 + $0x30] sm:$0xff]  ;;  %v75_v51 = vld [vmem:[#allocation4 + $0x38] sm:$0xff] }
  0x17   :  { %177 = vmatpush.msra.mxu1 %v595_v6  ;;  %202 = vmatpush.msra.mxu2 %v595_v6 }
  0x18   :  { %228 = vmatpush.msra.mxu3 %v595_v6  ;;  %330 = vmatpush.msrb.mxu0 %v586_v2 }
  0x19   :  { %178 = vmatpush.msra.mxu1 %v601_v7  ;;  %203 = vmatpush.msra.mxu2 %v601_v7 }
  0x1a   :  { %229 = vmatpush.msra.mxu3 %v601_v7  ;;  %331 = vmatpush.msrb.mxu0 %v591_v3 }
  0x1b   :  { %179 = vmatpush.msra.mxu1 %v607_v8  ;;  %204 = vmatpush.msra.mxu2 %v607_v8 }
  0x1c   :  { %230 = vmatpush.msra.mxu3 %v607_v8  ;;  %332 = vmatpush.msrb.mxu0 %v595_v6 }
  0x1d   :  { %180 = vmatpush.msra.mxu1 %v613_v9  ;;  %205 = vmatpush.msra.mxu2 %v613_v9 }
  0x1e   :  { %231 = vmatpush.msra.mxu3 %v613_v9  ;;  %333 = vmatpush.msrb.mxu0 %v601_v7 }
  0x1f   :  { %181 = vmatpush.msra.mxu1 %v619_v10  ;;  %206 = vmatpush.msra.mxu2 %v619_v10 }
  0x20   :  { %232 = vmatpush.msra.mxu3 %v619_v10  ;;  %334 = vmatpush.msrb.mxu0 %v607_v8 }
  0x21   :  { %182 = vmatpush.msra.mxu1 %v625_v11  ;;  %207 = vmatpush.msra.mxu2 %v625_v11 }
  0x22   :  { %233 = vmatpush.msra.mxu3 %v625_v11  ;;  %335 = vmatpush.msrb.mxu0 %v613_v9 }
  0x23   :  { %183 = vmatpush.msra.mxu1 %v631_v12  ;;  %208 = vmatpush.msra.mxu2 %v631_v12 }
  0x24   :  { %234 = vmatpush.msra.mxu3 %v631_v12  ;;  %336 = vmatpush.msrb.mxu0 %v619_v10 }
  0x25   :  { %184 = vmatpush.msra.mxu1 %v637_v13  ;;  %209 = vmatpush.msra.mxu2 %v637_v13 }
  0x26   :  { %235 = vmatpush.msra.mxu3 %v637_v13  ;;  %337 = vmatpush.msrb.mxu0 %v625_v11 }
  0x27   :  { %185 = vmatpush.msra.mxu1 %v643_v14  ;;  %210 = vmatpush.msra.mxu2 %v643_v14 }
  0x28   :  { %236 = vmatpush.msra.mxu3 %v643_v14  ;;  %338 = vmatpush.msrb.mxu0 %v631_v12 }
  0x29   :  { %186 = vmatpush.msra.mxu1 %v649_v15  ;;  %211 = vmatpush.msra.mxu2 %v649_v15 }
  0x2a   :  { %237 = vmatpush.msra.mxu3 %v649_v15  ;;  %339 = vmatpush.msrb.mxu0 %v637_v13 }
  0x2b   :  { %187 = vmatpush.msra.mxu1 %v655_v16  ;;  %212 = vmatpush.msra.mxu2 %v655_v16 }
  0x2c   :  { %238 = vmatpush.msra.mxu3 %v655_v16  ;;  %340 = vmatpush.msrb.mxu0 %v643_v14 }
  0x2d   :  { %188 = vmatpush.msra.mxu1 %v661_v17  ;;  %213 = vmatpush.msra.mxu2 %v661_v17 }
  0x2e   :  { %189 = vmatmul.f32.vlgmr.msra.gmra.mxu1 %v538_v18  ;;  %239 = vmatpush.msra.mxu3 %v661_v17 }
  0x2f   :  { %250 = vmatpush.msrb.mxu1 %v580_v0  ;;  %276 = vmatpush.msrb.mxu2 %v580_v0 }
  0x30   :  { %302 = vmatpush.msrb.mxu3 %v580_v0  ;;  %341 = vmatpush.msrb.mxu0 %v649_v15 }
  0x31   :  { %251 = vmatpush.msrb.mxu1 %v582_v1  ;;  %277 = vmatpush.msrb.mxu2 %v582_v1 }
  0x32   :  { %303 = vmatpush.msrb.mxu3 %v582_v1  ;;  %342 = vmatpush.msrb.mxu0 %v655_v16 }
  0x33   :  { %252 = vmatpush.msrb.mxu1 %v586_v2  ;;  %278 = vmatpush.msrb.mxu2 %v586_v2 }
  0x34   :  { %304 = vmatpush.msrb.mxu3 %v586_v2  ;;  %343 = vmatpush.msrb.mxu0 %v661_v17 }
  0x35   :  { %253 = vmatpush.msrb.mxu1 %v591_v3  ;;  %279 = vmatpush.msrb.mxu2 %v591_v3 }
  0x36   :  { %305 = vmatpush.msrb.mxu3 %v591_v3  ;;  %400 = vmatmul.msk.f32.gmra.mxu0 %vm81_vm0, %v69_v19 }
  0x37   :  { %254 = vmatpush.msrb.mxu1 %v595_v6  ;;  %280 = vmatpush.msrb.mxu2 %v595_v6 }
  0x38   :  { %306 = vmatpush.msrb.mxu3 %v595_v6 }
  0x39   :  { %255 = vmatpush.msrb.mxu1 %v601_v7  ;;  %281 = vmatpush.msrb.mxu2 %v601_v7 }
  0x3a   :  { %307 = vmatpush.msrb.mxu3 %v601_v7 }
  0x3b   :  { %256 = vmatpush.msrb.mxu1 %v607_v8  ;;  %282 = vmatpush.msrb.mxu2 %v607_v8 }
  0x3c   :  { %308 = vmatpush.msrb.mxu3 %v607_v8 }
  0x3d   :  { %257 = vmatpush.msrb.mxu1 %v613_v9  ;;  %283 = vmatpush.msrb.mxu2 %v613_v9 }
  0x3e   :  { %309 = vmatpush.msrb.mxu3 %v613_v9  ;;  %401 = vmatmul.msk.f32.gmra.mxu0 %vm81_vm0, %v70_v26 }
  0x3f   :  { %258 = vmatpush.msrb.mxu1 %v619_v10  ;;  %284 = vmatpush.msrb.mxu2 %v619_v10 }
  0x40   :  { %310 = vmatpush.msrb.mxu3 %v619_v10 }
  0x41   :  { %259 = vmatpush.msrb.mxu1 %v625_v11  ;;  %285 = vmatpush.msrb.mxu2 %v625_v11 }
  0x42   :  { %311 = vmatpush.msrb.mxu3 %v625_v11 }
  0x43   :  { %260 = vmatpush.msrb.mxu1 %v631_v12  ;;  %286 = vmatpush.msrb.mxu2 %v631_v12 }
  0x44   :  { %312 = vmatpush.msrb.mxu3 %v631_v12 }
  0x45   :  { %261 = vmatpush.msrb.mxu1 %v637_v13  ;;  %287 = vmatpush.msrb.mxu2 %v637_v13 }
  0x46   :  { %313 = vmatpush.msrb.mxu3 %v637_v13  ;;  %402 = vmatmul.msk.f32.gmra.mxu0 %vm81_vm0, %v71_v32 }
  0x47   :  { %262 = vmatpush.msrb.mxu1 %v643_v14  ;;  %288 = vmatpush.msrb.mxu2 %v643_v14 }
  0x48   :  { %314 = vmatpush.msrb.mxu3 %v643_v14 }
  0x49   :  { %263 = vmatpush.msrb.mxu1 %v649_v15  ;;  %289 = vmatpush.msrb.mxu2 %v649_v15 }
  0x4a   :  { %315 = vmatpush.msrb.mxu3 %v649_v15 }
  0x4b   :  { %264 = vmatpush.msrb.mxu1 %v655_v16  ;;  %290 = vmatpush.msrb.mxu2 %v655_v16 }
  0x4c   :  { %316 = vmatpush.msrb.mxu3 %v655_v16 }
  0x4d   :  { %265 = vmatpush.msrb.mxu1 %v661_v17  ;;  %291 = vmatpush.msrb.mxu2 %v661_v17 }
  0x4e   :  { %317 = vmatpush.msrb.mxu3 %v661_v17  ;;  %403 = vmatmul.msk.f32.gmra.mxu0 %vm81_vm0, %v72_v38 }
  0x4f   :  { %354 = vmatpush.msra.mxu1 %v580_v0 }
  0x51   :  { %355 = vmatpush.msra.mxu1 %v582_v1 }
  0x53   :  { %356 = vmatpush.msra.mxu1 %v586_v2 }
  0x55   :  { %357 = vmatpush.msra.mxu1 %v591_v3 }
  0x56   :  { %404 = vmatmul.msk.f32.gmra.mxu0 %vm81_vm0, %v73_v44 }
  0x57   :  { %358 = vmatpush.msra.mxu1 %v595_v6 }
  0x59   :  { %359 = vmatpush.msra.mxu1 %v601_v7 }
  0x5b   :  { %360 = vmatpush.msra.mxu1 %v607_v8 }
  0x5d   :  { %361 = vmatpush.msra.mxu1 %v613_v9 }
  0x5e   :  { %405 = vmatmul.msk.f32.gmra.mxu0 %vm81_vm0, %v74_v45 }
  0x5f   :  { %362 = vmatpush.msra.mxu1 %v619_v10 }
  0x61   :  { %363 = vmatpush.msra.mxu1 %v625_v11 }
  0x63   :  { %364 = vmatpush.msra.mxu1 %v631_v12 }
  0x65   :  { %365 = vmatpush.msra.mxu1 %v637_v13 }
  0x66   :  { %406 = vmatmul.msk.f32.gmra.mxu0 %vm81_vm0, %v75_v51 }
  0x67   :  { %366 = vmatpush.msra.mxu1 %v643_v14 }
  0x69   :  { %367 = vmatpush.msra.mxu1 %v649_v15 }
  0x6b   :  { %368 = vmatpush.msra.mxu1 %v655_v16 }
  0x6d   :  { %369 = vmatpush.msra.mxu1 %v661_v17 }
  0x8f   :  { %v123_v21 = vpop.f32.mrf.mxu0 }
  0x90   :  { %v124_v22 = vadd.f32 %v745_v20, %v123_v21 }
  0xab   :  { %v190_v23 = vpop.f32.mrf.mxu1 }
  0xac   :  { %v193_v24 = vadd.f32 %v190_v23, %v124_v22 }
  0xae   :  { %415 = vtanh.f32 %v193_v24 }
  0xb3   :  { %v126_v27 = vpop.f32.mrf.mxu0 }
  0xb4   :  { %v416_v25 = vpop.eup %415  ;;  %v127_v28 = vadd.f32 %v745_v20, %v126_v27 }
  0xb5   :  { %195 = vst [vmem:[#allocation10] sm:$0xff] %v416_v25  ;;  %214 = vmatmul.f32.vlgmr.msra.gmra.mxu2 %v416_v25 }
  0xbb   :  { %v129_v33 = vpop.f32.mrf.mxu0 }
  0xbc   :  { %v130_v34 = vadd.f32 %v745_v20, %v129_v33 }
  0xc3   :  { %v132_v39 = vpop.f32.mrf.mxu0 }
  0xc4   :  { %v133_v40 = vadd.f32 %v745_v20, %v132_v39 }
  0xcb   :  { %v135_v46 = vpop.f32.mrf.mxu0 }
  0xcc   :  { %v136_v47 = vadd.f32 %v745_v20, %v135_v46 }
  0xd3   :  { %v138_v52 = vpop.f32.mrf.mxu0 }
  0xd4   :  { %v139_v53 = vadd.f32 %v745_v20, %v138_v52 }
  0xdb   :  { %v141_v57 = vpop.f32.mrf.mxu0 }
  0xdc   :  { %v142_v59 = vadd.f32 %v745_v20, %v141_v57 }
  0xe3   :  { %v144_v58 = vpop.f32.mrf.mxu0 }
  0xe4   :  { %v145_v63 = vadd.f32 %v745_v20, %v144_v58 }
 0x138   :  { %v215_v29 = vpop.f32.mrf.mxu2 }
 0x139   :  { %v218_v30 = vadd.f32 %v215_v29, %v127_v28 }
 0x13b   :  { %417 = vtanh.f32 %v218_v30 }
 0x141   :  { %v418_v31 = vpop.eup %417 }
 0x142   :  { %221 = vst [vmem:[#allocation10 + $0x8] sm:$0xff] %v418_v31  ;;  %240 = vmatmul.f32.vlgmr.msra.gmra.mxu3 %v418_v31 }
 0x1c5   :  { %v241_v35 = vpop.f32.mrf.mxu3 }
 0x1c6   :  { %v244_v36 = vadd.f32 %v241_v35, %v130_v34 }
 0x1c8   :  { %419 = vtanh.f32 %v244_v36 }
 0x1ce   :  { %v420_v37 = vpop.eup %419 }
 0x1cf   :  { %247 = vst [vmem:[#allocation10 + $0x10] sm:$0xff] %v420_v37  ;;  %266 = vmatmul.f32.vlgmr.msrb.gmra.mxu1 %v420_v37 }
 0x24c   :  { %v267_v41 = vpop.f32.mrf.mxu1 }
 0x24d   :  { %v270_v42 = vadd.f32 %v267_v41, %v133_v40 }
 0x24f   :  { %421 = vtanh.f32 %v270_v42 }
 0x255   :  { %v422_v43 = vpop.eup %421 }
 0x256   :  { %273 = vst [vmem:[#allocation10 + $0x18] sm:$0xff] %v422_v43  ;;  %292 = vmatmul.f32.vlgmr.msrb.gmra.mxu2 %v422_v43 }
 0x2d9   :  { %v293_v48 = vpop.f32.mrf.mxu2 }
 0x2da   :  { %v296_v49 = vadd.f32 %v293_v48, %v136_v47 }
 0x2dc   :  { %423 = vtanh.f32 %v296_v49 }
 0x2e2   :  { %v424_v50 = vpop.eup %423 }
 0x2e3   :  { %299 = vst [vmem:[#allocation10 + $0x20] sm:$0xff] %v424_v50  ;;  %318 = vmatmul.f32.vlgmr.msrb.gmra.mxu3 %v424_v50 }
 0x366   :  { %v319_v54 = vpop.f32.mrf.mxu3 }
 0x367   :  { %v322_v55 = vadd.f32 %v319_v54, %v139_v53 }
 0x369   :  { %425 = vtanh.f32 %v322_v55 }
 0x36f   :  { %v426_v56 = vpop.eup %425 }
 0x370   :  { %325 = vst [vmem:[#allocation10 + $0x28] sm:$0xff] %v426_v56  ;;  %344 = vmatmul.f32.vlgmr.msrb.gmra.mxu0 %v426_v56 }
 0x3ed   :  { %v345_v60 = vpop.f32.mrf.mxu0 }
 0x3ee   :  { %v348_v61 = vadd.f32 %v345_v60, %v142_v59 }
 0x3f0   :  { %427 = vtanh.f32 %v348_v61 }
 0x3f6   :  { %v428_v62 = vpop.eup %427 }
 0x3f7   :  { %351 = vst [vmem:[#allocation10 + $0x30] sm:$0xff] %v428_v62  ;;  %370 = vmatmul.f32.vlgmr.msra.gmra.mxu1 %v428_v62 }
 0x474   :  { %v371_v0 = vpop.f32.mrf.mxu1 }
 0x475   :  { %v374_v1 = vadd.f32 %v371_v0, %v145_v63 }
 0x477   :  { %429 = vtanh.f32 %v374_v1 }
 0x47d   :  { %v430_v2 = vpop.eup %429 }
 0x47e   :  { %377 = vst [vmem:[#allocation10 + $0x38] sm:$0xff] %v430_v2 }
 0x47f   :  { %391 = dma.vmem_to_hbm [thread:$0]  %s384_s5, 1024, %s386_s8, [#allocation6], %s535_s25, %s535_s25, %s536_s26  }
 0x480   :  { %531 = dma.done.wait [#allocation6], 1024  }
 0x481   :  { %532 = vsyncadd [#allocation6], 4294966272 }
 0x482   :  { %396 = vsyncpa [#allocation5], 1 }
 0x483   :  { %397 = vsyncpa [#allocation8], 1 }
 0x484   :  { %398 = vsyncpa [#allocation6], 1 }

</bundles_post_ra>
